<compile_context>
chip_gen: v6e
topology: v6e:2x2x1
jax: 0.10.0
libtpu: 0.0.40
codegen_flags: <defaults>
</compile_context>

<pallas_src>
import jax
import jax.numpy as jnp
from jax.experimental import pallas as pl
from jax.experimental.pallas import tpu as pltpu


def _pooler_kernel(x_ref, w1_ref, b1_ref, w2_ref, b2_ref, out_ref):
    # x_ref: (TILE_B, N, d_in). AdaptiveAvgPool1d(1) == mean over the instance axis N.
    # The sum over N is a cheap cross-sublane (XLU) reduce; the kernel is HBM-bound
    # on the x stream anyway, so no weight replication / extra MXU work is needed.
    n = x_ref.shape[1]
    pooled = jnp.sum(x_ref[...].astype(jnp.float32), axis=1) * (1.0 / n)   # (TILE_B, d_in)

    # Linear(d_in -> d_model) + tanh. Cast the activations to the weight dtype so
    # bf16 weights take the native bf16 MXU path; accumulate in f32.
    h = jnp.dot(pooled.astype(w1_ref.dtype), w1_ref[...],
                preferred_element_type=jnp.float32) + b1_ref[...].astype(jnp.float32)
    feat = jnp.tanh(h)                                                     # (TILE_B, d_model)

    # classifier(d_model -> n_classes)
    logits = jnp.dot(feat.astype(w2_ref.dtype), w2_ref[...],
                     preferred_element_type=jnp.float32) + b2_ref[...].astype(jnp.float32)

    # One merged output slab (feat | logits): single writeback DMA stream per step.
    # softmax / argmax are computed in XLA on the tiny logits slice.
    d_model = feat.shape[1]
    out_ref[:, :d_model] = feat.astype(out_ref.dtype)
    out_ref[:, d_model:] = logits.astype(out_ref.dtype)


def _round_up(v, m):
    return -(-v // m) * m


def _vmem_capacity_bytes():
    # Generation-aware VMEM capacity (v5e/v6e: 128 MiB, v7x: 64 MiB per TC).
    try:
        return int(pltpu.get_tpu_info().vmem_capacity_bytes)
    except Exception:
        return 64 << 20  # conservative fallback (safe on every generation)


def _pick_tile_b(B, x_row_bytes, out_row_bytes, weight_bytes, vmem_cap, row_align):
    # Per-row block bytes (x block + output slab block), double-buffered by the pipeline.
    headroom = 16 << 20                       # compiler scratch / spill margin
    usable = max(vmem_cap - headroom - 2 * weight_bytes, 4 << 20)
    per_row = 2 * (x_row_bytes + out_row_bytes)
    max_tile = max(row_align, (usable // per_row) // row_align * row_align)

    # Tiny batches: one full-batch block (block dim == array dim is always legal),
    # but only if it actually fits the VMEM budget.
    if B <= 64 and B * per_row <= usable:
        return B

    # Largest aligned tile that fits, but force >= 2 grid steps so
    # dimension_semantics=("parallel",) can shard across v7x's two TensorCores and
    # the DMA pipeline has prefetch/writeback to overlap on every generation.
    tile = min(max_tile, _round_up(pl.cdiv(B, 2), row_align))
    return max(row_align, tile)


@jax.jit
def pooler_forward(x, w1, b1, w2, b2):
    """Pooler.cls_forward: mean-pool over instances, Linear + tanh, classifier,
    then softmax / argmax.  x: (B, N, d_in), w1: (d_in, d_model), w2: (d_model, C)."""
    B, N, d_in = x.shape
    d_model = w1.shape[1]
    C = w2.shape[1]
    out_w = d_model + C

    x_isz = jnp.dtype(x.dtype).itemsize
    w_isz = jnp.dtype(w1.dtype).itemsize
    x_row_bytes = N * d_in * x_isz
    out_row_bytes = out_w * 4
    weight_bytes = (d_in * d_model + d_model + d_model * C + C) * w_isz

    vmem_cap = _vmem_capacity_bytes()
    row_align = 16 if x.dtype == jnp.bfloat16 else 8
    tile_b = _pick_tile_b(B, x_row_bytes, out_row_bytes, weight_bytes, vmem_cap, row_align)
    grid = (pl.cdiv(B, tile_b),)

    # VMEM request: double-buffered blocks + resident weights + headroom, clamped
    # below the physical capacity of the current generation (64 MiB on v7x).
    need = 2 * tile_b * (x_row_bytes + out_row_bytes) + 2 * weight_bytes + (4 << 20)
    vmem_limit = int(min(max(need, 16 << 20), vmem_cap - (8 << 20)))

    slab = pl.pallas_call(
        _pooler_kernel,
        grid=grid,
        out_shape=jax.ShapeDtypeStruct((B, out_w), jnp.float32),
        in_specs=[
            pl.BlockSpec((tile_b, N, d_in), lambda i: (i, 0, 0)),   # x tile (streamed)
            pl.BlockSpec((d_in, d_model), lambda i: (0, 0)),        # w1 (VMEM-resident)
            pl.BlockSpec((1, d_model), lambda i: (0, 0)),           # b1
            pl.BlockSpec((d_model, C), lambda i: (0, 0)),           # w2
            pl.BlockSpec((1, C), lambda i: (0, 0)),                 # b2
        ],
        out_specs=pl.BlockSpec((tile_b, out_w), lambda i: (i, 0)),  # (feat | logits)
        compiler_params=pltpu.CompilerParams(
            dimension_semantics=("parallel",),
            vmem_limit_bytes=vmem_limit,
        ),
    )(x, w1, b1, w2, b2)

    feats = slab[:, :d_model]
    logits = slab[:, d_model:]
    # argmax / softmax on the tiny (B, C) logits are noise in XLA and avoid
    # narrow lane-width masked stores and the exp/divide in the kernel epilogue.
    y_hat = jnp.argmax(logits, axis=1).astype(jnp.int32)
    y_prob = jax.nn.softmax(logits, axis=1)
    return feats, logits, y_hat, y_prob


def _init_params(key, d_in, d_model, n_classes):
    k1, k2, k3, k4 = jax.random.split(key, 4)
    # nn.Linear-style uniform init, deterministic via PRNGKey.
    lim1 = 1.0 / (d_in ** 0.5)
    lim2 = 1.0 / (d_model ** 0.5)
    w1 = jax.random.uniform(k1, (d_in, d_model), jnp.float32, -lim1, lim1)
    b1 = jax.random.uniform(k2, (1, d_model), jnp.float32, -lim1, lim1)
    w2 = jax.random.uniform(k3, (d_model, n_classes), jnp.float32, -lim2, lim2)
    b2 = jax.random.uniform(k4, (1, n_classes), jnp.float32, -lim2, lim2)
    return w1, b1, w2, b2


if __name__ == "__main__":
    B, N, d_in, d_model, n_classes = 2, 8, 32, 32, 4

    key = jax.random.PRNGKey(0)
    kx, kp = jax.random.split(key)
    x = jax.random.normal(kx, (B, N, d_in), jnp.float32)
    w1, b1, w2, b2 = _init_params(kp, d_in, d_model, n_classes)

    feats, logits, y_hat, y_prob = pooler_forward(x, w1, b1, w2, b2)
    jax.block_until_ready((feats, logits, y_hat, y_prob))

    # pure-JAX reference check (cls_forward semantics)
    pooled = jnp.mean(x, axis=1)
    feat_ref = jnp.tanh(pooled @ w1 + b1)
    logits_ref = feat_ref @ w2 + b2
    assert jnp.allclose(feats, feat_ref, atol=1e-5)
    assert jnp.allclose(logits, logits_ref, atol=1e-5)
    assert jnp.allclose(y_prob, jax.nn.softmax(logits_ref, axis=1), atol=1e-5)
    assert jnp.array_equal(y_hat, jnp.argmax(logits_ref, axis=1).astype(jnp.int32))

    print("KERNEL_OK")
</pallas_src>

<mosaic_0001>
module attributes {stable_mosaic.version = 11 : i64} {
  func.func @_pooler_kernel(%arg0: i32, %arg1: memref<2x8x32xf32, #tpu.memory_space<vmem>>, %arg2: memref<32x32xf32, #tpu.memory_space<vmem>>, %arg3: memref<1x32xf32, #tpu.memory_space<vmem>>, %arg4: memref<32x4xf32, #tpu.memory_space<vmem>>, %arg5: memref<1x4xf32, #tpu.memory_space<vmem>>, %arg6: memref<2x36xf32, #tpu.memory_space<vmem>>) attributes {dimension_semantics = [#tpu.dimension_semantics<parallel>], iteration_bounds = array<i64: 1>, scalar_prefetch = 0 : i64, scratch_operands = 0 : i64, tpu.core_type = #tpu.core_type<tc>, window_params = [{transform_indices = @transform_0, window_bounds = array<i64: 2, 8, 32>}, {pipeline_mode = #tpu.pipeline_mode<synchronous>, transform_indices = @transform_1, window_bounds = array<i64: 32, 32>}, {pipeline_mode = #tpu.pipeline_mode<synchronous>, transform_indices = @transform_2, window_bounds = array<i64: 1, 32>}, {pipeline_mode = #tpu.pipeline_mode<synchronous>, transform_indices = @transform_3, window_bounds = array<i64: 32, 4>}, {pipeline_mode = #tpu.pipeline_mode<synchronous>, transform_indices = @transform_4, window_bounds = array<i64: 1, 4>}, {transform_indices = @transform_5, window_bounds = array<i64: 2, 36>}]} {
    %c0 = arith.constant 0 : index
    %c0_0 = arith.constant 0 : index
    %c0_1 = arith.constant 0 : index
    %0 = vector.load %arg1[%c0, %c0_0, %c0_1] : memref<2x8x32xf32, #tpu.memory_space<vmem>>, vector<2x8x32xf32>
    %cst = arith.constant dense<0.000000e+00> : vector<2x32xf32>
    %1 = vector.multi_reduction <add>, %0, %cst [1] : vector<2x8x32xf32> to vector<2x32xf32>
    %cst_2 = arith.constant 1.250000e-01 : f32
    %2 = vector.broadcast %cst_2 : f32 to vector<2x32xf32>
    %3 = arith.mulf %1, %2 : vector<2x32xf32>
    %c0_3 = arith.constant 0 : index
    %c0_4 = arith.constant 0 : index
    %4 = vector.load %arg2[%c0_3, %c0_4] : memref<32x32xf32, #tpu.memory_space<vmem>>, vector<32x32xf32>
    %cst_5 = arith.constant dense<0.000000e+00> : vector<2x32xf32>
    %5 = tpu.matmul %3, %4, %cst_5 {dimension_numbers = #tpu.dot_dimension_numbers<[1], [0], [0], [1], [0, 0, 1, 1], [], []>} : vector<2x32xf32>, vector<32x32xf32>, vector<2x32xf32> -> vector<2x32xf32>
    %c0_6 = arith.constant 0 : index
    %c0_7 = arith.constant 0 : index
    %6 = vector.load %arg3[%c0_6, %c0_7] : memref<1x32xf32, #tpu.memory_space<vmem>>, vector<1x32xf32>
    %7 = vector.broadcast %6 : vector<1x32xf32> to vector<2x32xf32>
    %8 = arith.addf %5, %7 : vector<2x32xf32>
    %9 = math.tanh %8 : vector<2x32xf32>
    %c0_8 = arith.constant 0 : index
    %c0_9 = arith.constant 0 : index
    %10 = vector.load %arg4[%c0_8, %c0_9] : memref<32x4xf32, #tpu.memory_space<vmem>>, vector<32x4xf32>
    %cst_10 = arith.constant dense<0.000000e+00> : vector<2x4xf32>
    %11 = tpu.matmul %9, %10, %cst_10 {dimension_numbers = #tpu.dot_dimension_numbers<[1], [0], [0], [1], [0, 0, 1, 1], [], []>} : vector<2x32xf32>, vector<32x4xf32>, vector<2x4xf32> -> vector<2x4xf32>
    %c0_11 = arith.constant 0 : index
    %c0_12 = arith.constant 0 : index
    %12 = vector.load %arg5[%c0_11, %c0_12] : memref<1x4xf32, #tpu.memory_space<vmem>>, vector<1x4xf32>
    %13 = vector.broadcast %12 : vector<1x4xf32> to vector<2x4xf32>
    %14 = arith.addf %11, %13 : vector<2x4xf32>
    %c0_13 = arith.constant 0 : index
    %c0_14 = arith.constant 0 : index
    %15 = vector.load %arg6[%c0_13, %c0_14] : memref<2x36xf32, #tpu.memory_space<vmem>>, vector<2x32xf32>
    tpu.vector_store %arg6[%c0_13, %c0_14], %9 {strides = array<i32>} : memref<2x36xf32, #tpu.memory_space<vmem>>, vector<2x32xf32>,
    %c0_15 = arith.constant 0 : index
    %c32 = arith.constant 32 : index
    %16 = vector.load %arg6[%c0_15, %c32] : memref<2x36xf32, #tpu.memory_space<vmem>>, vector<2x4xf32>
    tpu.vector_store %arg6[%c0_15, %c32], %14 {strides = array<i32>} : memref<2x36xf32, #tpu.memory_space<vmem>>, vector<2x4xf32>,
    return
  }
  func.func @transform_0(%arg0: i32) -> (i32, i32, i32) {
    %c0_i32 = arith.constant 0 : i32
    %c0_i32_0 = arith.constant 0 : i32
    %c0_i32_1 = arith.constant 0 : i32
    return %arg0, %c0_i32, %c0_i32_0 : i32, i32, i32
  }
  func.func @transform_1(%arg0: i32) -> (i32, i32) {
    %c0_i32 = arith.constant 0 : i32
    %c0_i32_0 = arith.constant 0 : i32
    %c0_i32_1 = arith.constant 0 : i32
    return %c0_i32, %c0_i32_0 : i32, i32
  }
  func.func @transform_2(%arg0: i32) -> (i32, i32) {
    %c0_i32 = arith.constant 0 : i32
    %c0_i32_0 = arith.constant 0 : i32
    %c0_i32_1 = arith.constant 0 : i32
    return %c0_i32, %c0_i32_0 : i32, i32
  }
  func.func @transform_3(%arg0: i32) -> (i32, i32) {
    %c0_i32 = arith.constant 0 : i32
    %c0_i32_0 = arith.constant 0 : i32
    %c0_i32_1 = arith.constant 0 : i32
    return %c0_i32, %c0_i32_0 : i32, i32
  }
  func.func @transform_4(%arg0: i32) -> (i32, i32) {
    %c0_i32 = arith.constant 0 : i32
    %c0_i32_0 = arith.constant 0 : i32
    %c0_i32_1 = arith.constant 0 : i32
    return %c0_i32, %c0_i32_0 : i32, i32
  }
  func.func @transform_5(%arg0: i32) -> (i32, i32) {
    %c0_i32 = arith.constant 0 : i32
    %c0_i32_0 = arith.constant 0 : i32
    return %arg0, %c0_i32 : i32, i32
  }
}

</mosaic_0001>

<bundles_post_ra>
// kernel: pooler_forward.1
= control target key start
LH: loop header
LB: loop body
LE: loop exit
PB: predicated region body
PF: predicated region fallthrough
CT: control target
= control target key end

     0   :  { %10 = vsyncpa [#allocation3], 0  ;;  %s304_s18 = smov [#allocation2]   ;;  %s383_s0 = inlined_call_operand.hbm [shape: f32[2,8,32], index: 0, kind: input, shape index: {}]   ;;  %s384_s1 = inlined_call_operand.vmem [shape: f32[32,32], index: 1, kind: input, shape index: {}]   ;;  %s385_s2 = inlined_call_operand.vmem [shape: f32[1,32], index: 2, kind: input, shape index: {}]   ;;  %s386_s3 = inlined_call_operand.vmem [shape: f32[32,4], index: 3, kind: input, shape index: {}]   ;;  %s387_s4 = inlined_call_operand.vmem [shape: f32[1,4], index: 4, kind: input, shape index: {}]   ;;  %s388_s5 = inlined_call_operand.vmem [shape: f32[2,36], index: 5, kind: output, shape index: {}]  }
   0x1   :  { %s16_s19 = sshll.u32 %s304_s18, 4  ;;  %s17_s19 = int_to_ptr.vmem [resolvable:$true] %s16_s19 }
   0x2   :  { %s290_s20 = scalar_lea.vmem %s17_s19, 256  ;;  %p295_p1 = scmp.lt.s32.totalorder %s17_s19, %s17_s19 }
   0x3   :  { %p291_p0 = scmp.ne.s32.totalorder %s17_s19, %s290_s20  ;;  %p296_p2 = scmp.lt.s32.totalorder %s290_s20, %s290_s20 }
   0x5   :  { %p297_p3 = por %p296_p2, %p295_p1 }
   0x7   :  { %p298_p4 = pnand %p297_p3, %p291_p0 }
   0x9   :  { %301 = shalt.err (!%p298_p4)
}
   0xa   :  { %s305_s21 = smov 128   ;;  %s306_s22 = smov 8  }
   0xb   :  { %22 = dma.hbm_to_vmem [thread:$0]  %s383_s0, 256, %s17_s19, [#allocation3], %s305_s21, %s305_s21, %s306_s22  }
   0xc   :  { %302 = dma.done.wait [#allocation3], 256  }
   0xd   :  { %303 = vsyncadd [#allocation3], 4294967040  ;;  %v307_v0 = vmov 0.0   ;;  %vm308_vm0 = vmmov 0   ;;  %vm36_vm1 = vcmask 261120   ;;  %v56_v1 = vld [vmem:[%s384_s1 + $0x18] sm:$0xff] }
   0xe   :  { %252 = vmatprep.subr.mxu0 %v307_v0  ;;  %260 = vmatprep.mubr.msk.f32.mxu0 %vm308_vm0, %v307_v0  ;;  %v55_v2 = vld [vmem:[%s384_s1 + $0x10] sm:$0xff]  ;;  %v34_v3 = vld [vmem:[#allocation2] sm:$0xff]  ;;  %v35_v4 = vld [vmem:[#allocation2 + $0x8] sm:$0xff]  ;;  %vm66_vm2 = vcmask 1041409   ;;  %vm225_vm3 = vcmask 254976   ;;  %vm231_vm4 = vcmask 288000  }
   0xf   :  { %263 = vmatprep.subr.mxu1 %v307_v0  ;;  %271 = vmatprep.mubr.msk.f32.mxu1 %vm308_vm0, %v307_v0  ;;  %v54_v5 = vld [vmem:[%s384_s1 + $0x8] sm:$0xff]  ;;  %v37_v6 = vsel %vm36_vm1, %v34_v3, 0.0  ;;  %v44_v7 = vsel %vm36_vm1, %v35_v4, 0.0  ;;  %v53_v10 = vld [vmem:[%s384_s1] sm:$0xff]  ;;  %v144_v24 = vld [vmem:[%s386_s3 + $0x18] sm:$0xff] }
  0x10   :  { %253 = vmatpush3.msra.mxu0 %v56_v1  ;;  %v38_v8 = vrot.slane %v37_v6, 4  ;;  %v45_v9 = vrot.slane %v44_v7, 4  ;;  %v143_v25 = vld [vmem:[%s386_s3 + $0x10] sm:$0xff]  ;;  %264 = vmatpush3.msra.mxu1 %v144_v24  ;;  %v142_v26 = vld [vmem:[%s386_s3 + $0x8] sm:$0xff]  ;;  %v141_v27 = vld [vmem:[%s386_s3] sm:$0xff] }
  0x11   :  { %254 = vmatprep.subr.mxu0 %v307_v0  ;;  %265 = vmatprep.subr.mxu1 %v307_v0  ;;  %v238_v28 = vld [vmem:[%s385_s2] ss:$0 sm:$0xff]  ;;  %s309_s2 = smov 32  }
  0x12   :  { %255 = vmatpush3.msra.mxu0 %v55_v2  ;;  %v39_v11 = vadd.f32 %v38_v8, %v37_v6  ;;  %v46_v12 = vadd.f32 %v45_v9, %v44_v7  ;;  %266 = vmatpush3.msra.mxu1 %v143_v25  ;;  %v240_v33 = vld [vmem:[%s387_s4] ss:$0 sm:$0xff] }
  0x13   :  { %256 = vmatprep.subr.mxu0 %v307_v0  ;;  %267 = vmatprep.subr.mxu1 %v307_v0 }
  0x14   :  { %257 = vmatpush3.msra.mxu0 %v54_v5  ;;  %v40_v13 = vrot.slane %v39_v11, 2  ;;  %v47_v14 = vrot.slane %v46_v12, 2  ;;  %268 = vmatpush3.msra.mxu1 %v142_v26 }
  0x15   :  { %258 = vmatprep.subr.mxu0 %v307_v0  ;;  %269 = vmatprep.subr.mxu1 %v307_v0 }
  0x16   :  { %259 = vmatpush3.msra.mxu0 %v53_v10  ;;  %v41_v15 = vadd.f32 %v40_v13, %v39_v11  ;;  %v48_v16 = vadd.f32 %v47_v14, %v46_v12  ;;  %270 = vmatpush3.msra.mxu1 %v141_v27 }
  0x18   :  { %v42_v17 = vrot.slane %v41_v15, 1  ;;  %v49_v18 = vrot.slane %v48_v16, 1 }
  0x1a   :  { %v43_v19 = vadd.f32 %v42_v17, %v41_v15  ;;  %v50_v20 = vadd.f32 %v49_v18, %v48_v16 }
  0x1c   :  { %v51_v21 = vmul.f32 0.125, %v43_v19  ;;  %v52_v22 = vmul.f32 0.125, %v50_v20 }
  0x1e   :  { %v67_v23 = vsel %vm66_vm2, %v52_v22, %v51_v21 }
  0x1f   :  { %261 = vmatmul.mubr.msk.f32.vlgmr.msra.gmra.mxu0 %vm36_vm1, %v67_v23 }
  0xdf   :  { %v136_v29 = vpop.f32.mrf.mxu0 }
  0xe0   :  { %v137_v30 = vadd.f32 %v238_v28, %v136_v29 }
  0xe1   :  { %v262_v31 = vpop.f32.mrf.mxu0 }
  0xe2   :  { %280 = vtanh.f32 %v137_v30 }
  0xef   :  { %v281_v32 = vpop.eup %280 }
  0xf0   :  { %272 = vmatmul.mubr.msk.f32.vlgmr.msra.gmra.mxu1 %vm36_vm1, %v281_v32  ;;  %226 = vst.msk [vmem:[%s388_s5] sm:$0x3] %vm225_vm3, %v281_v32 }
 0x1b0   :  { %v221_v34 = vpop.f32.mrf.mxu1 }
 0x1b1   :  { %v222_v35 = vadd.f32 %v240_v33, %v221_v34 }
 0x1b2   :  { %v273_v36 = vpop.f32.mrf.mxu1 }
 0x1b3   :  { %228 = vrot.lane.b32.xlu0 %v222_v35, %s309_s2 }
 0x225   :  { %v229_v37 = vpop.permute.xlu0 %228 }
 0x226   :  { %232 = vst.msk [vmem:[%s388_s5] sm:$0x3] %vm231_vm4, %v229_v37 }
 0x227   :  { %237 = vsyncpa [#allocation3], 1 }

</bundles_post_ra>
